<compile_context>
chip_gen: v7x
topology: tpu7x:2x2x1
jax: 0.10.0
libtpu: 0.0.40
codegen_flags: <defaults>
</compile_context>

<pallas_src>
import jax
import jax.numpy as jnp
from jax.experimental import pallas as pl
from jax.experimental.pallas import tpu as pltpu


def _round_up(x, m):
    return ((x + m - 1) // m) * m


def _fuse_kernel(x_ref, w1_ref, b1_ref, w2_ref, b2_ref, w3_ref, b3_ref, out_ref):
    C = out_ref.shape[0]
    x = x_ref[...]                                          # (2C, P) f32, [hist; curr]

    # conv1_1 + folded bn1_1 + relu: ONE K=2C MXU matmul, f32 accumulation,
    # single downcast, then bias+relu in the elementwise dtype (bf16 on v6e/v7x).
    h1 = jnp.dot(w1_ref[...], x.astype(w1_ref.dtype),
                 preferred_element_type=jnp.float32)        # (128, P) f32
    h1 = jnp.maximum(h1.astype(b1_ref.dtype) + b1_ref[...], 0)   # (128, P) ew

    # conv1_2 + folded bn1_2 + relu.
    h2 = jnp.dot(w2_ref[...], h1.astype(w2_ref.dtype),
                 preferred_element_type=jnp.float32)        # (32, P) f32
    h2 = jnp.maximum(h2.astype(b2_ref.dtype) + b2_ref[...], 0)   # (32, P) ew

    # conv1_3 (32 -> 1) on the MXU: (1,32) @ (32,P); sigmoid in f32 on the EUP.
    logit = jnp.dot(w3_ref[...], h2.astype(w3_ref.dtype),
                    preferred_element_type=jnp.float32) + b3_ref[0]   # (1, P)
    w = jax.nn.sigmoid(logit)                               # (1, P) f32

    # Gate broadcast over C sublanes; blend as hist + w*(curr - hist) (f32).
    hist = x[:C]
    curr = x[C:]
    out_ref[...] = (hist + w * (curr - hist)).astype(out_ref.dtype)


def _fold_bn(w, b, gamma, beta, mean, var, eps=1e-5):
    # w: (Cin, Cout) matmul weight; b: (Cout,)
    scale = gamma / jnp.sqrt(var + eps)
    return w * scale[None, :], (b - mean) * scale + beta


def pointwise_fusion_wowarp(curr_feature, hist_feature, params, *,
                            tile=8192, min_steps=8,
                            matmul_dtype=jnp.bfloat16, elementwise_dtype=None):
    """curr_feature/hist_feature: NCHW float32. Returns NCHW fused feature.

    elementwise_dtype: dtype for the h1/h2 bias+relu intermediates; defaults to
    matmul_dtype (bf16 -> good on v6e/v7x).  Pass jnp.float32 on v5e.
    """
    N, C, H, W = curr_feature.shape
    HW = H * W
    ew_dtype = matmul_dtype if elementwise_dtype is None else elementwise_dtype

    # Single dense layer-1 operand: stack [hist, curr] along channels once in
    # the wrapper (dense 2C sublanes, one DMA stream, one K=2C matmul), then a
    # free reshape to (N, 2C, H*W).  No NCHW<->NHWC transposes anywhere.
    x3 = jnp.concatenate([hist_feature, curr_feature], axis=1).reshape(N, 2 * C, HW)

    # Pixel tile on the lane axis: big (amortize ~0.35us/grid-step overhead),
    # but shrunk so the grid keeps >= min_steps steps for pipelining / 2 cores.
    tile_p = min(_round_up(tile, 128), _round_up(HW, 128))
    while tile_p > 512 and N * (-(-HW // tile_p)) < min_steps:
        tile_p = _round_up(tile_p // 2, 128)
    HWp = _round_up(HW, tile_p)
    if HWp != HW:
        x3 = jnp.pad(x3, ((0, 0), (0, 0), (0, HWp - HW)))

    # Fold eval-mode BatchNorm into the 1x1-conv weights (trace-time glue) and
    # transpose the tiny weights once so the kernel computes W @ X.
    w1, b1 = _fold_bn(params["w1"], params["b1"], params["bn1_g"],
                      params["bn1_b"], params["bn1_m"], params["bn1_v"])
    w2, b2 = _fold_bn(params["w2"], params["b2"], params["bn2_g"],
                      params["bn2_b"], params["bn2_m"], params["bn2_v"])
    w1t = jnp.transpose(w1).astype(matmul_dtype)            # (128, 2C)
    w2t = jnp.transpose(w2).astype(matmul_dtype)            # (32, 128)
    w3r = params["w3"].reshape(1, -1).astype(matmul_dtype)  # (1, 32)
    b1c = b1.reshape(-1, 1).astype(ew_dtype)                # (128, 1)
    b2c = b2.reshape(-1, 1).astype(ew_dtype)                # (32, 1)
    b3s = params["b3"].reshape(1).astype(jnp.float32)       # (1,) -> SMEM

    H1, H2 = w1t.shape[0], w2t.shape[0]                     # 128, 32
    grid = (N, HWp // tile_p)

    out = pl.pallas_call(
        _fuse_kernel,
        out_shape=jax.ShapeDtypeStruct((N, C, HWp), curr_feature.dtype),
        grid_spec=pltpu.PrefetchScalarGridSpec(
            num_scalar_prefetch=0,
            grid=grid,
            in_specs=[
                pl.BlockSpec((None, 2 * C, tile_p), lambda n, p: (n, 0, p)),  # x
                pl.BlockSpec((H1, 2 * C), lambda n, p: (0, 0)),     # W1
                pl.BlockSpec((H1, 1), lambda n, p: (0, 0)),         # b1
                pl.BlockSpec((H2, H1), lambda n, p: (0, 0)),        # W2
                pl.BlockSpec((H2, 1), lambda n, p: (0, 0)),         # b2
                pl.BlockSpec((1, H2), lambda n, p: (0, 0)),         # w3
                pl.BlockSpec(memory_space=pltpu.MemorySpace.SMEM),  # b3 scalar
            ],
            out_specs=pl.BlockSpec((None, C, tile_p), lambda n, p: (n, 0, p)),
        ),
        compiler_params=pltpu.CompilerParams(
            dimension_semantics=("parallel", "parallel")),
    )(x3, w1t, b1c, w2t, b2c, w3r, b3s)

    # Drop pixel padding (if any) and restore NCHW — reshape only, no transpose.
    return out[:, :, :HW].reshape(N, C, H, W)


def _reference_wowarp(curr, hist, params, eps=1e-5):
    """Pure-JAX reference of PointwiseFusion.forward_wowarp (eval-mode BN)."""
    N, C, H, W = curr.shape

    def conv1x1(x_nchw, w_io, b):
        y = jnp.einsum("nchw,cd->ndhw", x_nchw, w_io)
        return y + b[None, :, None, None]

    def bn(x, g, b, m, v):
        return (x - m[None, :, None, None]) / jnp.sqrt(v + eps)[None, :, None, None] \
               * g[None, :, None, None] + b[None, :, None, None]

    x = jnp.concatenate([hist, curr], axis=1)
    x1 = jax.nn.relu(bn(conv1x1(x, params["w1"], params["b1"]),
                        params["bn1_g"], params["bn1_b"],
                        params["bn1_m"], params["bn1_v"]))
    x1 = jax.nn.relu(bn(conv1x1(x1, params["w2"], params["b2"]),
                        params["bn2_g"], params["bn2_b"],
                        params["bn2_m"], params["bn2_v"]))
    x1 = conv1x1(x1, params["w3"], params["b3"])
    tw = jax.nn.sigmoid(x1)                      # (N, 1, H, W)
    tw = jnp.broadcast_to(tw, (N, C, H, W))      # expand(-1, C, -1, -1)
    return tw * curr + (1.0 - tw) * hist


def _init_params(key, channel_size):
    c2 = 2 * channel_size
    ks = jax.random.split(key, 8)
    p = {
        # conv weights stored as (Cin, Cout) matmul weights (1x1 convs)
        "w1": 0.1 * jax.random.normal(ks[0], (c2, 128), jnp.float32),
        "b1": 0.05 * jax.random.normal(ks[1], (128,), jnp.float32),
        "w2": 0.1 * jax.random.normal(ks[2], (128, 32), jnp.float32),
        "b2": 0.05 * jax.random.normal(ks[3], (32,), jnp.float32),
        "w3": 0.1 * jax.random.normal(ks[4], (32, 1), jnp.float32),
        "b3": 0.05 * jax.random.normal(ks[5], (1,), jnp.float32),
        # BatchNorm (eval mode) params — deterministic, non-trivial
        "bn1_g": 1.0 + 0.1 * jax.random.normal(ks[6], (128,), jnp.float32),
        "bn1_b": jnp.full((128,), 0.01, jnp.float32),
        "bn1_m": jnp.full((128,), 0.02, jnp.float32),
        "bn1_v": jnp.full((128,), 0.9, jnp.float32),
        "bn2_g": 1.0 + 0.1 * jax.random.normal(ks[7], (32,), jnp.float32),
        "bn2_b": jnp.full((32,), -0.01, jnp.float32),
        "bn2_m": jnp.full((32,), 0.03, jnp.float32),
        "bn2_v": jnp.full((32,), 1.1, jnp.float32),
    }
    return p


if __name__ == "__main__":
    key = jax.random.PRNGKey(0)
    k1, k2, k3 = jax.random.split(key, 3)

    N, C, H, W = 2, 4, 16, 16   # args['channel_size'] = 4
    curr = jax.random.normal(k1, (N, C, H, W), jnp.float32)
    hist = jax.random.normal(k2, (N, C, H, W), jnp.float32)
    params = _init_params(k3, C)

    ref = jax.block_until_ready(_reference_wowarp(curr, hist, params))

    # Exact-path check (f32 matmuls + f32 elementwise) — tight tolerance.
    fused_f32 = jax.block_until_ready(
        pointwise_fusion_wowarp(curr, hist, params, matmul_dtype=jnp.float32))
    assert fused_f32.shape == (N, C, H, W)
    assert jnp.allclose(fused_f32, ref, atol=1e-4, rtol=1e-4), "f32 mismatch vs reference"

    # Fast path (bf16 matmuls + bf16 bias/relu intermediates) — looser tolerance.
    fused = jax.block_until_ready(pointwise_fusion_wowarp(curr, hist, params))
    assert fused.shape == (N, C, H, W)
    assert jnp.allclose(fused, ref, atol=3e-2, rtol=3e-2), "bf16 mismatch vs reference"
    assert float(jnp.mean(jnp.abs(fused - ref))) < 3e-3, "bf16 mean error too large"

    print("KERNEL_OK")
</pallas_src>

<mosaic_0001>
module attributes {stable_mosaic.version = 11 : i64} {
  func.func @_fuse_kernel(%arg0: i32, %arg1: i32, %arg2: memref<1x8x256xf32, #tpu.memory_space<vmem>>, %arg3: memref<128x8xf32, #tpu.memory_space<vmem>>, %arg4: memref<128x1xf32, #tpu.memory_space<vmem>>, %arg5: memref<32x128xf32, #tpu.memory_space<vmem>>, %arg6: memref<32x1xf32, #tpu.memory_space<vmem>>, %arg7: memref<1x32xf32, #tpu.memory_space<vmem>>, %arg8: memref<1xf32, #tpu.memory_space<smem>>, %arg9: memref<1x4x256xf32, #tpu.memory_space<vmem>>) attributes {dimension_semantics = [#tpu.dimension_semantics<parallel>, #tpu.dimension_semantics<parallel>], iteration_bounds = array<i64: 2, 1>, scalar_prefetch = 0 : i64, scratch_operands = 0 : i64, tpu.core_type = #tpu.core_type<tc>, window_params = [{transform_indices = @transform_0, window_bounds = array<i64: 1, 8, 256>}, {pipeline_mode = #tpu.pipeline_mode<synchronous>, transform_indices = @transform_1, window_bounds = array<i64: 128, 8>}, {pipeline_mode = #tpu.pipeline_mode<synchronous>, transform_indices = @transform_2, window_bounds = array<i64: 128, 1>}, {pipeline_mode = #tpu.pipeline_mode<synchronous>, transform_indices = @transform_3, window_bounds = array<i64: 32, 128>}, {pipeline_mode = #tpu.pipeline_mode<synchronous>, transform_indices = @transform_4, window_bounds = array<i64: 32, 1>}, {pipeline_mode = #tpu.pipeline_mode<synchronous>, transform_indices = @transform_5, window_bounds = array<i64: 1, 32>}, {transform_indices = @transform_6, window_bounds = array<i64: 1>}, {transform_indices = @transform_7, window_bounds = array<i64: 1, 4, 256>}]} {
    %c0 = arith.constant 0 : index
    %c0_0 = arith.constant 0 : index
    %c0_1 = arith.constant 0 : index
    %0 = vector.load %arg2[%c0, %c0_0, %c0_1] : memref<1x8x256xf32, #tpu.memory_space<vmem>>, vector<1x8x256xf32>
    %1 = vector.shape_cast %0 : vector<1x8x256xf32> to vector<8x256xf32>
    %c0_2 = arith.constant 0 : index
    %c0_3 = arith.constant 0 : index
    %2 = vector.load %arg3[%c0_2, %c0_3] : memref<128x8xf32, #tpu.memory_space<vmem>>, vector<128x8xf32>
    %cst = arith.constant dense<0.000000e+00> : vector<128x256xf32>
    %3 = tpu.matmul %2, %1, %cst {dimension_numbers = #tpu.dot_dimension_numbers<[1], [0], [0], [1], [0, 0, 1, 1], [], []>} : vector<128x8xf32>, vector<8x256xf32>, vector<128x256xf32> -> vector<128x256xf32>
    %c0_4 = arith.constant 0 : index
    %c0_5 = arith.constant 0 : index
    %4 = vector.load %arg4[%c0_4, %c0_5] : memref<128x1xf32, #tpu.memory_space<vmem>>, vector<128x1xf32>
    %5 = vector.broadcast %4 : vector<128x1xf32> to vector<128x256xf32>
    %6 = arith.addf %3, %5 : vector<128x256xf32>
    %cst_6 = arith.constant 0.000000e+00 : f32
    %7 = vector.broadcast %cst_6 : f32 to vector<128x256xf32>
    %8 = arith.maximumf %6, %7 : vector<128x256xf32>
    %c0_7 = arith.constant 0 : index
    %c0_8 = arith.constant 0 : index
    %9 = vector.load %arg5[%c0_7, %c0_8] : memref<32x128xf32, #tpu.memory_space<vmem>>, vector<32x128xf32>
    %cst_9 = arith.constant dense<0.000000e+00> : vector<32x256xf32>
    %10 = tpu.matmul %9, %8, %cst_9 {dimension_numbers = #tpu.dot_dimension_numbers<[1], [0], [0], [1], [0, 0, 1, 1], [], []>} : vector<32x128xf32>, vector<128x256xf32>, vector<32x256xf32> -> vector<32x256xf32>
    %c0_10 = arith.constant 0 : index
    %c0_11 = arith.constant 0 : index
    %11 = vector.load %arg6[%c0_10, %c0_11] : memref<32x1xf32, #tpu.memory_space<vmem>>, vector<32x1xf32>
    %12 = vector.broadcast %11 : vector<32x1xf32> to vector<32x256xf32>
    %13 = arith.addf %10, %12 : vector<32x256xf32>
    %cst_12 = arith.constant 0.000000e+00 : f32
    %14 = vector.broadcast %cst_12 : f32 to vector<32x256xf32>
    %15 = arith.maximumf %13, %14 : vector<32x256xf32>
    %c0_13 = arith.constant 0 : index
    %c0_14 = arith.constant 0 : index
    %16 = vector.load %arg7[%c0_13, %c0_14] : memref<1x32xf32, #tpu.memory_space<vmem>>, vector<1x32xf32>
    %cst_15 = arith.constant dense<0.000000e+00> : vector<1x256xf32>
    %17 = tpu.matmul %16, %15, %cst_15 {dimension_numbers = #tpu.dot_dimension_numbers<[1], [0], [0], [1], [0, 0, 1, 1], [], []>} : vector<1x32xf32>, vector<32x256xf32>, vector<1x256xf32> -> vector<1x256xf32>
    %c0_16 = arith.constant 0 : index
    %18 = memref.load %arg8[%c0_16] : memref<1xf32, #tpu.memory_space<smem>>
    %19 = vector.broadcast %18 : f32 to vector<1x256xf32>
    %20 = arith.addf %17, %19 : vector<1x256xf32>
    %21 = arith.negf %20 : vector<1x256xf32>
    %22 = math.exp %21 : vector<1x256xf32>
    %cst_17 = arith.constant 1.000000e+00 : f32
    %23 = vector.broadcast %cst_17 : f32 to vector<1x256xf32>
    %24 = arith.addf %23, %22 : vector<1x256xf32>
    %25 = arith.divf %23, %24 : vector<1x256xf32>
    %26 = vector.extract_strided_slice %1 {offsets = [0, 0], sizes = [4, 256], strides = [1, 1]} : vector<8x256xf32> to vector<4x256xf32>
    %27 = vector.extract_strided_slice %1 {offsets = [4, 0], sizes = [4, 256], strides = [1, 1]} : vector<8x256xf32> to vector<4x256xf32>
    %28 = arith.subf %27, %26 : vector<4x256xf32>
    %29 = vector.broadcast %25 : vector<1x256xf32> to vector<4x256xf32>
    %30 = arith.mulf %29, %28 : vector<4x256xf32>
    %31 = arith.addf %26, %30 : vector<4x256xf32>
    %c0_18 = arith.constant 0 : index
    %c0_19 = arith.constant 0 : index
    %c0_20 = arith.constant 0 : index
    %32 = vector.load %arg9[%c0_18, %c0_19, %c0_20] : memref<1x4x256xf32, #tpu.memory_space<vmem>>, vector<1x4x256xf32>
    %33 = vector.shape_cast %32 : vector<1x4x256xf32> to vector<4x256xf32>
    %34 = vector.shape_cast %31 : vector<4x256xf32> to vector<1x4x256xf32>
    tpu.vector_store %arg9[%c0_18, %c0_19, %c0_20], %34 {strides = array<i32>} : memref<1x4x256xf32, #tpu.memory_space<vmem>>, vector<1x4x256xf32>,
    return
  }
  func.func @transform_0(%arg0: i32, %arg1: i32) -> (i32, i32, i32) {
    %c0_i32 = arith.constant 0 : i32
    %c0_i32_0 = arith.constant 0 : i32
    return %arg0, %c0_i32, %arg1 : i32, i32, i32
  }
  func.func @transform_1(%arg0: i32, %arg1: i32) -> (i32, i32) {
    %c0_i32 = arith.constant 0 : i32
    %c0_i32_0 = arith.constant 0 : i32
    %c0_i32_1 = arith.constant 0 : i32
    return %c0_i32, %c0_i32_0 : i32, i32
  }
  func.func @transform_2(%arg0: i32, %arg1: i32) -> (i32, i32) {
    %c0_i32 = arith.constant 0 : i32
    %c0_i32_0 = arith.constant 0 : i32
    %c0_i32_1 = arith.constant 0 : i32
    return %c0_i32, %c0_i32_0 : i32, i32
  }
  func.func @transform_3(%arg0: i32, %arg1: i32) -> (i32, i32) {
    %c0_i32 = arith.constant 0 : i32
    %c0_i32_0 = arith.constant 0 : i32
    %c0_i32_1 = arith.constant 0 : i32
    return %c0_i32, %c0_i32_0 : i32, i32
  }
  func.func @transform_4(%arg0: i32, %arg1: i32) -> (i32, i32) {
    %c0_i32 = arith.constant 0 : i32
    %c0_i32_0 = arith.constant 0 : i32
    %c0_i32_1 = arith.constant 0 : i32
    return %c0_i32, %c0_i32_0 : i32, i32
  }
  func.func @transform_5(%arg0: i32, %arg1: i32) -> (i32, i32) {
    %c0_i32 = arith.constant 0 : i32
    %c0_i32_0 = arith.constant 0 : i32
    %c0_i32_1 = arith.constant 0 : i32
    return %c0_i32, %c0_i32_0 : i32, i32
  }
  func.func @transform_6(%arg0: i32, %arg1: i32) -> i32 {
    %c0_i32 = arith.constant 0 : i32
    %c0_i32_0 = arith.constant 0 : i32
    return %c0_i32 : i32
  }
  func.func @transform_7(%arg0: i32, %arg1: i32) -> (i32, i32, i32) {
    %c0_i32 = arith.constant 0 : i32
    %c0_i32_0 = arith.constant 0 : i32
    return %arg0, %c0_i32, %arg1 : i32, i32, i32
  }
}

</mosaic_0001>

<bundles_post_ra>
// kernel: tpu_custom_call.1
= control target key start
LH: loop header
LB: loop body
LE: loop exit
PB: predicated region body
PF: predicated region fallthrough
CT: control target
= control target key end

     0   :  { %s1555_s0 = inlined_call_operand.vmem [shape: f32[2,8,256], index: 0, kind: input, shape index: {}]   ;;  %s1556_s1 = inlined_call_operand.vmem [shape: f32[128,8], index: 1, kind: input, shape index: {}]   ;;  %s1557_s2 = inlined_call_operand.vmem [shape: f32[128,1], index: 2, kind: input, shape index: {}]   ;;  %s1558_s3 = inlined_call_operand.vmem [shape: f32[32,128], index: 3, kind: input, shape index: {}]   ;;  %s1559_s4 = inlined_call_operand.vmem [shape: f32[32,1], index: 4, kind: input, shape index: {}]   ;;  %s1560_s5 = inlined_call_operand.vmem [shape: f32[1,32], index: 5, kind: input, shape index: {}]   ;;  %s1561_s6 = inlined_call_operand.<no memory space> [shape: f32[1], index: 6, kind: input, shape index: {}]   ;;  %s1562_s7 = inlined_call_operand.hbm [shape: f32[2,4,256], index: 7, kind: output, shape index: {}]  }
   0x1   :  { %12 = sst [smem:[#allocation2]] %s1561_s6 }
   0x2   :  { %13 = vsyncpa [#allocation4], 0 }
   0x3   :  { %15 = vsyncpa [#allocation4 + $0x1], 0  ;;  %s1271_s26 = smov 0   ;;  %s1273_s27 = smov 0  }
   0x4   :  { %s1275_s28 = smov 0   ;;  %s1277_s29 = smov 0  }
   0x5   :  { %s1279_s30 = smov 0   ;;  %s1281_s8 = smov 0  }
   0x6 LB: > { %s1004_s6 = sadd.s32 4294967295, %s1223_s8   ;;  %s1005_s9 = sadd.s32 4294967294, %s1223_s8   ;;  %s1223_s8 = sphi %s1281_s8, %s21_s8   ;;  %s1219_s30 = sphi %s1279_s30, %s1569_s30   ;;  %s1215_s29 = sphi %s1277_s29, %s1568_s29   ;;  %s1211_s28 = sphi %s1275_s28, %s1567_s28   ;;  %s1207_s27 = sphi %s1273_s27, %s1566_s27   ;;  %s1203_s26 = sphi %s1271_s26, %s1565_s26  }
   0x7   : > { %s33_s10 = sadd.s32 1, %s1219_s30  ;;  %s196_s11 = sadd.s32 1, %s1211_s28 }
   0x8   : > { %p35_p0 = scmp.ge.s32.totalorder %s33_s10, 2  ;;  %p206_p1 = scmp.ne.s32.totalorder %s1211_s28, %s1207_s27 }
   0x9   : > { %p207_p2 = scmp.eq.s32.totalorder %s1004_s6, 1  ;;  %p212_p3 = scmp.ne.s32.totalorder %s1207_s27, %s1203_s26 }
   0xa   : > { %s1571_s10 = smov (%p35_p0, %s33_s10), 0  ;;  %p213_p5 = scmp.eq.s32.totalorder %s1005_s9, 1 }
   0xb   : > { %p1311_p4 = por %p207_p2, %p206_p1  ;;  %s191_s13 = ssub.s32 %s1219_s30, %s1571_s10 }
   0xc   : > { %p1008_p6 = scmp.ge.s32.totalorder %s1223_s8, 1  ;;  %p194_p7 = scmp.eq.s32.totalorder %s191_s13, 0 }
   0xd   : > { %p1318_p8 = por %p213_p5, %p212_p3  ;;  %p262_p9 = scmp.lt.s32.totalorder %s1223_s8, 3 }
   0xe   : > { %s1324_s15 = scalar_select %p194_p7, %s1211_s28, %s196_s11  }
   0xf   : > { %p263_p10 = pnand %p1008_p6, %p262_p9 }
  0x10   : > { %p299_p11 = scmp.lt.s32.totalorder (!%p263_p10), %s1215_s29, 1  ;;  %v1225_v0 = vmov (!%p263_p10), 0.0   ;;  %v1226_v1 = vmov (!%p263_p10), 0   ;;  %v327_v2 = vld [vmem:[%s1557_s2] sm:$0xff] (!%p263_p10)  ;;  %v329_v3 = vld [vmem:[%s1557_s2 + $0x10] sm:$0xff] (!%p263_p10)  ;;  %vm423_vm0 = vcmask (!%p263_p10), 64512  }
  0x11   : > { %266 = sbr.rel (%p263_p10) target bundleno = 814 (0x32e), region = 48  ;;  %536 = vmatprep.mubr.f32.mxu0 (!%p263_p10), %v1225_v0  ;;  %757 = vmatprep.mubr.f32.mxu1 (!%p263_p10), %v1225_v0  ;;  %v311_v6 = vld [vmem:[%s1556_s1] sm:$0xff] (!%p263_p10)  ;;  %v328_v7 = vld [vmem:[%s1557_s2 + $0x8] sm:$0xff] (!%p263_p10)  ;;  %v330_v8 = vld [vmem:[%s1557_s2 + $0x18] sm:$0xff] (!%p263_p10)  ;;  %vm793_vm1 = vcmask (!%p263_p10), 261120   ;;  %s791_s19 = sld [smem:[#allocation2]] (!%p263_p10) }
  0x12   : > { %1135 = vset.pattern.permute.xlu0 (!%p263_p10), %v1226_v1  ;;  %1136 = vset.pattern.permute.xlu1 (!%p263_p10), %v1226_v1  ;;  %v312_v9 = vld [vmem:[%s1556_s1 + $0x8] sm:$0xff] (!%p263_p10)  ;;  %v331_v10 = vld [vmem:[%s1557_s2 + $0x20] sm:$0xff] (!%p263_p10)  ;;  %v313_v12 = vld [vmem:[%s1556_s1 + $0x10] sm:$0xff] (!%p263_p10)  ;;  %s1037_s22 = sshll.u32 (!%p263_p10), %s1215_s29, 7 }
  0x13   : > { %345 = vperm.xlu0 (!%p263_p10), %1135, %v327_v2   ;;  %355 = vperm.xlu1 (!%p263_p10), %1136, %v329_v3   ;;  %v332_v11 = vld [vmem:[%s1557_s2 + $0x28] sm:$0xff] (!%p263_p10)  ;;  %v333_v13 = vld [vmem:[%s1557_s2 + $0x30] sm:$0xff] (!%p263_p10)  ;;  %v334_v14 = vld [vmem:[%s1557_s2 + $0x38] sm:$0xff] (!%p263_p10)  ;;  %s1508_s9 = scalar_lea.hbm (!%p263_p10), %s1562_s7, %s1037_s22 }
  0x14   : > { %v314_v15 = vld [vmem:[%s1556_s1 + $0x18] sm:$0xff] (!%p263_p10)  ;;  %v335_v16 = vld [vmem:[%s1557_s2 + $0x40] sm:$0xff] (!%p263_p10)  ;;  %v336_v17 = vld [vmem:[%s1557_s2 + $0x48] sm:$0xff] (!%p263_p10) }
  0x15   : > { %v315_v18 = vld [vmem:[%s1556_s1 + $0x20] sm:$0xff] (!%p263_p10)  ;;  %v337_v19 = vld [vmem:[%s1557_s2 + $0x50] sm:$0xff] (!%p263_p10)  ;;  %v338_v20 = vld [vmem:[%s1557_s2 + $0x58] sm:$0xff] (!%p263_p10) }
  0x16   : > { %v316_v21 = vld [vmem:[%s1556_s1 + $0x28] sm:$0xff] (!%p263_p10)  ;;  %v339_v22 = vld [vmem:[%s1557_s2 + $0x60] sm:$0xff] (!%p263_p10)  ;;  %v317_v24 = vld [vmem:[%s1556_s1 + $0x30] sm:$0xff] (!%p263_p10) }
  0x17   : > { %350 = vperm.xlu0 (!%p263_p10), %1135, %v328_v7   ;;  %360 = vperm.xlu1 (!%p263_p10), %1136, %v330_v8   ;;  %v340_v23 = vld [vmem:[%s1557_s2 + $0x68] sm:$0xff] (!%p263_p10)  ;;  %v341_v25 = vld [vmem:[%s1557_s2 + $0x70] sm:$0xff] (!%p263_p10)  ;;  %v342_v26 = vld [vmem:[%s1557_s2 + $0x78] sm:$0xff] (!%p263_p10) }
  0x18   : > { %s300_s16 = scalar_select %p299_p11, %s1215_s29, 1  ;;  %v318_v27 = vld [vmem:[%s1556_s1 + $0x38] sm:$0xff]  ;;  %v669_v28 = vld [vmem:[%s1559_s4] sm:$0xff]  ;;  %v670_v29 = vld [vmem:[%s1559_s4 + $0x8] sm:$0xff] }
  0x19   : > { %v319_v30 = vld [vmem:[%s1556_s1 + $0x40] sm:$0xff]  ;;  %v671_v31 = vld [vmem:[%s1559_s4 + $0x10] sm:$0xff]  ;;  %v672_v32 = vld [vmem:[%s1559_s4 + $0x18] sm:$0xff]  ;;  %s1227_s29 = smov [#allocation3]  }
  0x1a   : > { %s1036_s17 = sshll.u32 %s300_s16, 4  ;;  %v320_v33 = vld [vmem:[%s1556_s1 + $0x48] sm:$0xff]  ;;  %v321_v34 = vld [vmem:[%s1556_s1 + $0x50] sm:$0xff]  ;;  %v322_v35 = vld [vmem:[%s1556_s1 + $0x58] sm:$0xff]  ;;  %s1149_s16 = sshll.u32 %s1227_s29, 4  ;;  %s1150_s16 = int_to_ptr.vmem [resolvable:$false] %s1149_s16 }
  0x1b   : > { %s306_s20 = scalar_lea.vmem %s1555_s0, %s1036_s17  ;;  %365 = vperm.xlu0 %1135, %v331_v10   ;;  %370 = vperm.xlu1 %1136, %v332_v11   ;;  %v323_v36 = vld [vmem:[%s1556_s1 + $0x60] sm:$0xff]  ;;  %v324_v37 = vld [vmem:[%s1556_s1 + $0x68] sm:$0xff]  ;;  %v325_v38 = vld [vmem:[%s1556_s1 + $0x70] sm:$0xff]  ;;  %s1151_s17 = scalar_lea.vmem %s1150_s16, 256 }
  0x1c   : > { %v1339_v4 = vld [vmem:[%s306_s20 + $0x8] sm:$0xff]  ;;  %v1341_v5 = vld [vmem:[%s306_s20] sm:$0xff]  ;;  %v326_v39 = vld [vmem:[%s1556_s1 + $0x78] sm:$0xff]  ;;  %s295_s20 = sand.u32 1, %s1207_s27  }
  0x1d   : > { %472 = vmatprep.subr.mxu0 %v1339_v4  ;;  %s1009_s21 = sshll.u32 %s295_s20, 3  ;;  %s912_s11 = scalar_lea.sflag [#allocation4], %s295_s20 }
  0x1e   : > { %473 = vmatpush1.msra.mxu0 %v1341_v5  ;;  %s297_s23 = scalar_lea.vmem [#allocation3], %s1009_s21 }
  0x1f   : > { %1012 = vmatmul.mubr.msk.f32.vlgmr.msra.gmra.mrb[0].mxu0 %vm423_vm0, %v311_v6  ;;  %375 = vperm.xlu0 %1135, %v333_v13   ;;  %s928_s24 = sshll.u32 %s297_s23, 4  ;;  %s1510_s24 = int_to_ptr.vmem [resolvable:$true] %s928_s24 }
  0x20   : > { %542 = vmatprep.mubr.f32.mxu0 %v1225_v0  ;;  %380 = vperm.xlu1 %1136, %v334_v14   ;;  %s1145_s13 = scalar_lea.vmem %s1510_s24, 128  ;;  %p1152_p1 = scmp.lt.s32.totalorder %s1510_s24, %s1150_s16 }
  0x21   : > { %p1146_p12 = scmp.ne.s32.totalorder %s1510_s24, %s1145_s13  ;;  %p1153_p2 = scmp.lt.s32.totalorder %s1151_s17, %s1145_s13 }
  0x23   : > { %1013 = vmatmul.mubr.msk.f32.gmra.mrb[2].mxu0 %vm423_vm0, %v312_v9  ;;  %385 = vperm.xlu0 %1135, %v335_v16   ;;  %p1147_p13 = pnand %p1146_p12, %p1311_p4  ;;  %p1154_p3 = por %p1153_p2, %p1152_p1 }
  0x24   : > { %548 = vmatprep.mubr.f32.mxu0 %v1225_v0  ;;  %390 = vperm.xlu1 %1136, %v336_v17  }
  0x25   : > { %p1148_p0 = pneg %p1147_p13 }
  0x27   : > { %1014 = vmatmul.mubr.msk.f32.gmra.mrb[4].mxu0 %vm423_vm0, %v313_v12  ;;  %395 = vperm.xlu0 %1135, %v337_v19   ;;  %p1155_p5 = pnand %p1154_p3, %p1148_p0 }
  0x28   : > { %554 = vmatprep.mubr.f32.mxu0 %v1225_v0  ;;  %400 = vperm.xlu1 %1136, %v338_v20  }
  0x2b   : > { %1015 = vmatmul.mubr.msk.f32.gmra.mrb[6].mxu0 %vm423_vm0, %v314_v15  ;;  %405 = vperm.xlu0 %1135, %v339_v22  }
  0x2c   : > { %560 = vmatprep.mubr.f32.mxu0 %v1225_v0  ;;  %410 = vperm.xlu1 %1136, %v340_v23  }
  0x2f   : > { %1016 = vmatmul.mubr.msk.f32.gmra.mrb[8].mxu0 %vm423_vm0, %v315_v18  ;;  %415 = vperm.xlu0 %1135, %v341_v25  }
  0x30   : > { %566 = vmatprep.mubr.f32.mxu0 %v1225_v0  ;;  %420 = vperm.xlu1 %1136, %v342_v26  }
  0x33   : > { %1017 = vmatmul.mubr.msk.f32.gmra.mrb[10].mxu0 %vm423_vm0, %v316_v21  ;;  %675 = vperm.xlu0 %1135, %v669_v28  }
  0x34   : > { %572 = vmatprep.mubr.f32.mxu0 %v1225_v0  ;;  %680 = vperm.xlu1 %1136, %v670_v29  }
  0x37   : > { %1018 = vmatmul.mubr.msk.f32.gmra.mrb[12].mxu0 %vm423_vm0, %v317_v24  ;;  %685 = vperm.xlu0 %1135, %v671_v31  }
  0x38   : > { %578 = vmatprep.mubr.f32.mxu0 %v1225_v0  ;;  %690 = vperm.xlu1 %1136, %v672_v32  }
  0x3b   : > { %1019 = vmatmul.mubr.msk.f32.gmra.mrb[14].mxu0 %vm423_vm0, %v318_v27 }
  0x3c   : > { %584 = vmatprep.mubr.f32.mxu0 %v1225_v0 }
  0x3f   : > { %1020 = vmatmul.mubr.msk.f32.gmra.mrb[16].mxu0 %vm423_vm0, %v319_v30 }
  0x40   : > { %590 = vmatprep.mubr.f32.mxu0 %v1225_v0 }
  0x43   : > { %1021 = vmatmul.mubr.msk.f32.gmra.mrb[18].mxu0 %vm423_vm0, %v320_v33 }
  0x44   : > { %596 = vmatprep.mubr.f32.mxu0 %v1225_v0 }
  0x47   : > { %1022 = vmatmul.mubr.msk.f32.gmra.mrb[20].mxu0 %vm423_vm0, %v321_v34 }
  0x48   : > { %602 = vmatprep.mubr.f32.mxu0 %v1225_v0 }
  0x4b   : > { %1023 = vmatmul.mubr.msk.f32.gmra.mrb[22].mxu0 %vm423_vm0, %v322_v35 }
  0x4c   : > { %608 = vmatprep.mubr.f32.mxu0 %v1225_v0 }
  0x4f   : > { %1024 = vmatmul.mubr.msk.f32.gmra.mrb[24].mxu0 %vm423_vm0, %v323_v36 }
  0x50   : > { %614 = vmatprep.mubr.f32.mxu0 %v1225_v0 }
  0x53   : > { %1025 = vmatmul.mubr.msk.f32.gmra.mrb[26].mxu0 %vm423_vm0, %v324_v37 }
  0x54   : > { %620 = vmatprep.mubr.f32.mxu0 %v1225_v0 }
  0x57   : > { %1026 = vmatmul.mubr.msk.f32.gmra.mrb[28].mxu0 %vm423_vm0, %v325_v38 }
  0x58   : > { %626 = vmatprep.mubr.f32.mxu0 %v1225_v0 }
  0x5b   : > { %1027 = vmatmul.mubr.msk.f32.gmra.mrb[30].mxu0 %vm423_vm0, %v326_v39 }
  0x92   : > { %v346_v40 = vpop.permute.xlu0 %345  ;;  %v356_v49 = vpop.permute.xlu1 %355 }
  0x96   : > { %v351_v44 = vpop.permute.xlu0 %350  ;;  %v361_v60 = vpop.permute.xlu1 %360 }
  0x9a   : > { %v366_v12 = vpop.permute.xlu0 %365  ;;  %v371_v15 = vpop.permute.xlu1 %370 }
  0x9e   : > { %v376_v28 = vpop.permute.xlu0 %375 }
  0x9f   : > { %v381_v31 = vpop.permute.xlu1 %380 }
  0xf2   : > { %v538_v41 = vpop.f32.mrb[0].mxu0 }
  0xf3   : > { %v540_v42 = vpop.f32.mrb[1].mxu0  ;;  %v539_v43 = vadd.f32 %v538_v41, %v346_v40 }
  0xf4   : > { %v541_v45 = vadd.f32 %v540_v42, %v346_v40 }
  0xf5   : > { %v633_v51 = vmax.f32 %v539_v43, 0.0 }
  0xf6   : > { %v544_v46 = vpop.f32.mrb[2].mxu0  ;;  %v634_v53 = vmax.f32 %v541_v45, 0.0 }
  0xf7   : > { %v545_v47 = vadd.f32 %v544_v46, %v351_v44  ;;  %v546_v48 = vpop.f32.mrb[3].mxu0 }
  0xf8   : > { %v547_v50 = vadd.f32 %v546_v48, %v351_v44  ;;  %v386_v44 = vpop.permute.xlu0 %385 }
  0xf9   : > { %v635_v52 = vmax.f32 %v545_v47, 0.0  ;;  %v391_v47 = vpop.permute.xlu1 %390 }
  0xfa   : > { %v636_v54 = vmax.f32 %v547_v50, 0.0  ;;  %v550_v55 = vpop.f32.mrb[4].mxu0 }
  0xfb   : > { %v552_v56 = vpop.f32.mrb[5].mxu0  ;;  %v1040_v57 = vpack.c.bf16 %v635_v52, %v633_v51  ;;  %v551_v59 = vadd.f32 %v550_v55, %v356_v49 }
  0xfc   : > { %v1038_v58 = vpack.c.bf16 %v636_v54, %v634_v53  ;;  %v553_v61 = vadd.f32 %v552_v56, %v356_v49 }
  0xfd   : > { %v637_v3 = vmax.f32 %v551_v59, 0.0 }
  0xfe   : > { %v556_v62 = vpop.f32.mrb[6].mxu0  ;;  %1039 = vmatprep.subr.bf16.mxu1 %v1038_v58  ;;  %v638_v7 = vmax.f32 %v553_v61, 0.0 }
  0xff   : > { %v557_v63 = vadd.f32 %v556_v62, %v361_v60  ;;  %v558_v1 = vpop.f32.mrb[7].mxu0  ;;  %1041 = vmatpush1.bf16.msra.mxu1 %v1040_v57 }
 0x100   : > { %v559_v2 = vadd.f32 %v558_v1, %v361_v60  ;;  %v396_v60 = vpop.permute.xlu0 %395 }
 0x101   : > { %v639_v6 = vmax.f32 %v557_v63, 0.0  ;;  %v401_v63 = vpop.permute.xlu1 %400 }
 0x102   : > { %v640_v8 = vmax.f32 %v559_v2, 0.0  ;;  %v562_v9 = vpop.f32.mrb[8].mxu0 }
 0x103   : > { %v1044_v10 = vpack.c.bf16 %v639_v6, %v637_v3  ;;  %v564_v11 = vpop.f32.mrb[9].mxu0  ;;  %v563_v14 = vadd.f32 %v562_v9, %v366_v12 }
 0x104   : > { %v1042_v13 = vpack.c.bf16 %v640_v8, %v638_v7  ;;  %v565_v16 = vadd.f32 %v564_v11, %v366_v12 }
 0x105   : > { %v641_v21 = vmax.f32 %v563_v14, 0.0 }
 0x106   : > { %v568_v17 = vpop.f32.mrb[10].mxu0  ;;  %1043 = vmatprep.subr.bf16.mxu1 %v1042_v13  ;;  %v642_v23 = vmax.f32 %v565_v16, 0.0 }
 0x107   : > { %v569_v18 = vadd.f32 %v568_v17, %v371_v15  ;;  %v570_v19 = vpop.f32.mrb[11].mxu0  ;;  %1045 = vmatpush1.bf16.msra.mxu1 %v1044_v10 }
 0x108   : > { %v571_v20 = vadd.f32 %v570_v19, %v371_v15  ;;  %v406_v15 = vpop.permute.xlu0 %405 }
 0x109   : > { %v643_v22 = vmax.f32 %v569_v18, 0.0  ;;  %v411_v18 = vpop.permute.xlu1 %410 }
 0x10a   : > { %v644_v24 = vmax.f32 %v571_v20, 0.0  ;;  %v574_v25 = vpop.f32.mrb[12].mxu0 }
 0x10b   : > { %v1048_v26 = vpack.c.bf16 %v643_v22, %v641_v21  ;;  %v576_v27 = vpop.f32.mrb[13].mxu0  ;;  %v575_v30 = vadd.f32 %v574_v25, %v376_v28 }
 0x10c   : > { %v1046_v29 = vpack.c.bf16 %v644_v24, %v642_v23  ;;  %v577_v32 = vadd.f32 %v576_v27, %v376_v28 }
 0x10d   : > { %v645_v37 = vmax.f32 %v575_v30, 0.0 }
 0x10e   : > { %v580_v33 = vpop.f32.mrb[14].mxu0  ;;  %1047 = vmatprep.subr.bf16.mxu1 %v1046_v29  ;;  %v646_v39 = vmax.f32 %v577_v32, 0.0 }
 0x10f   : > { %v581_v34 = vadd.f32 %v580_v33, %v381_v31  ;;  %v582_v35 = vpop.f32.mrb[15].mxu0  ;;  %1049 = vmatpush1.bf16.msra.mxu1 %v1048_v26 }
 0x110   : > { %v583_v36 = vadd.f32 %v582_v35, %v381_v31  ;;  %v416_v31 = vpop.permute.xlu0 %415 }
 0x111   : > { %v647_v38 = vmax.f32 %v581_v34, 0.0  ;;  %v421_v34 = vpop.permute.xlu1 %420 }
 0x112   : > { %v648_v40 = vmax.f32 %v583_v36, 0.0  ;;  %v586_v41 = vpop.f32.mrb[16].mxu0 }
 0x113   : > { %v1052_v42 = vpack.c.bf16 %v647_v38, %v645_v37  ;;  %v588_v43 = vpop.f32.mrb[17].mxu0  ;;  %v587_v46 = vadd.f32 %v586_v41, %v386_v44 }
 0x114   : > { %v1050_v45 = vpack.c.bf16 %v648_v40, %v646_v39  ;;  %v589_v48 = vadd.f32 %v588_v43, %v386_v44 }
 0x115   : > { %v649_v53 = vmax.f32 %v587_v46, 0.0  ;;  %v665_v46 = vld [vmem:[%s1558_s3] sm:$0xff] }
 0x116   : > { %v592_v49 = vpop.f32.mrb[18].mxu0  ;;  %1051 = vmatprep.subr.bf16.mxu1 %v1050_v45  ;;  %v650_v55 = vmax.f32 %v589_v48, 0.0  ;;  %v667_v48 = vld [vmem:[%s1558_s3 + $0x10] sm:$0xff] }
 0x117   : > { %v593_v50 = vadd.f32 %v592_v49, %v391_v47  ;;  %v594_v51 = vpop.f32.mrb[19].mxu0  ;;  %1053 = vmatpush1.bf16.msra.mxu1 %v1052_v42  ;;  %v668_v49 = vld [vmem:[%s1558_s3 + $0x18] sm:$0xff] }
 0x118   : > { %v595_v52 = vadd.f32 %v594_v51, %v391_v47  ;;  %v666_v47 = vld [vmem:[%s1558_s3 + $0x8] sm:$0xff] }
 0x119   : > { %v651_v54 = vmax.f32 %v593_v50, 0.0 }
 0x11a   : > { %v652_v56 = vmax.f32 %v595_v52, 0.0  ;;  %v598_v57 = vpop.f32.mrb[20].mxu0  ;;  %v676_v52 = vpop.permute.xlu0 %675 }
 0x11b   : > { %v1056_v58 = vpack.c.bf16 %v651_v54, %v649_v53  ;;  %v600_v59 = vpop.f32.mrb[21].mxu0  ;;  %v599_v62 = vadd.f32 %v598_v57, %v396_v60  ;;  %v681_v54 = vpop.permute.xlu1 %680 }
 0x11c   : > { %v1054_v61 = vpack.c.bf16 %v652_v56, %v650_v55  ;;  %v601_v1 = vadd.f32 %v600_v59, %v396_v60 }
 0x11d   : > { %v653_v8 = vmax.f32 %v599_v62, 0.0 }
 0x11e   : > { %v604_v2 = vpop.f32.mrb[22].mxu0  ;;  %1055 = vmatprep.subr.bf16.mxu1 %v1054_v61  ;;  %v654_v10 = vmax.f32 %v601_v1, 0.0 }
 0x11f   : > { %v605_v3 = vadd.f32 %v604_v2, %v401_v63  ;;  %v606_v6 = vpop.f32.mrb[23].mxu0  ;;  %1057 = vmatpush1.bf16.msra.mxu1 %v1056_v58 }
 0x120   : > { %v607_v7 = vadd.f32 %v606_v6, %v401_v63  ;;  %v686_v6 = vpop.permute.xlu0 %685 }
 0x121   : > { %v655_v9 = vmax.f32 %v605_v3, 0.0 }
 0x122   : > { %v656_v11 = vmax.f32 %v607_v7, 0.0  ;;  %v610_v12 = vpop.f32.mrb[24].mxu0 }
 0x123   : > { %v1060_v13 = vpack.c.bf16 %v655_v9, %v653_v8  ;;  %v612_v14 = vpop.f32.mrb[25].mxu0  ;;  %v611_v17 = vadd.f32 %v610_v12, %v406_v15  ;;  %v691_v8 = vpop.permute.xlu1 %690 }
 0x124   : > { %v1058_v16 = vpack.c.bf16 %v656_v11, %v654_v10  ;;  %v613_v19 = vadd.f32 %v612_v14, %v406_v15 }
 0x125   : > { %v657_v24 = vmax.f32 %v611_v17, 0.0 }
 0x126   : > { %v616_v20 = vpop.f32.mrb[26].mxu0  ;;  %1059 = vmatprep.subr.bf16.mxu1 %v1058_v16  ;;  %v658_v26 = vmax.f32 %v613_v19, 0.0 }
 0x127   : > { %v617_v21 = vadd.f32 %v616_v20, %v411_v18  ;;  %v618_v22 = vpop.f32.mrb[27].mxu0  ;;  %1061 = vmatpush1.bf16.msra.mxu1 %v1060_v13  ;;  %v790_v20 = vld [vmem:[%s1560_s5] sm:$0x1] }
 0x128   : > { %v619_v23 = vadd.f32 %v618_v22, %v411_v18 }
 0x129   : > { %v659_v25 = vmax.f32 %v617_v21, 0.0  ;;  %v792_v21 = vstv %s791_s19 }
 0x12a   : > { %v660_v27 = vmax.f32 %v619_v23, 0.0  ;;  %v622_v28 = vpop.f32.mrb[28].mxu0 }
 0x12b   : > { %v1064_v29 = vpack.c.bf16 %v659_v25, %v657_v24  ;;  %v624_v30 = vpop.f32.mrb[29].mxu0  ;;  %v623_v33 = vadd.f32 %v622_v28, %v416_v31 }
 0x12c   : > { %v1062_v32 = vpack.c.bf16 %v660_v27, %v658_v26  ;;  %v625_v35 = vadd.f32 %v624_v30, %v416_v31 }
 0x12d   : > { %v661_v40 = vmax.f32 %v623_v33, 0.0 }
 0x12e   : > { %v628_v36 = vpop.f32.mrb[30].mxu0  ;;  %1063 = vmatprep.subr.bf16.mxu1 %v1062_v32  ;;  %v662_v42 = vmax.f32 %v625_v35, 0.0  ;;  %v888_v32 = vlaneseq  ;;  %v883_v35 = vrot.slane %v1339_v4, 4 }
 0x12f   : > { %v629_v37 = vadd.f32 %v628_v36, %v421_v34  ;;  %v630_v38 = vpop.f32.mrb[31].mxu0  ;;  %1065 = vmatpush1.bf16.msra.mxu1 %v1064_v29 }
 0x130   : > { %v631_v39 = vadd.f32 %v630_v38, %v421_v34  ;;  %v889_v33 = vshrl.u32 %v888_v32, 7  ;;  %v882_v34 = vrot.slane %v1341_v5, 4 }
 0x131   : > { %v663_v41 = vmax.f32 %v629_v37, 0.0 }
 0x132   : > { %v664_v43 = vmax.f32 %v631_v39, 0.0  ;;  %v890_v36 = vsub.s32 0, %v889_v33  ;;  %v886_v37 = vsub.f32 %v1341_v5, %v882_v34  ;;  %v887_v39 = vsub.f32 %v1339_v4, %v883_v35 }
 0x133   : > { %v1068_v44 = vpack.c.bf16 %v663_v41, %v661_v40 }
 0x134   : > { %v1066_v45 = vpack.c.bf16 %v664_v43, %v662_v42 }
 0x136   : > { %1067 = vmatprep.subr.bf16.mxu1 %v1066_v45 }
 0x137   : > { %1069 = vmatpush1.bf16.msra.mxu1 %v1068_v44 }
 0x13a   : > { %758 = vmatmul.mubr.f32.vlgmr.msra.gmra.mrb[0].mxu1 %v665_v46 }
 0x13b   : > { %763 = vmatprep.mubr.f32.mxu1 %v1225_v0 }
 0x13e   : > { %764 = vmatmul.mubr.f32.gmra.mrb[2].mxu1 %v666_v47 }
 0x13f   : > { %769 = vmatprep.mubr.f32.mxu1 %v1225_v0 }
 0x142   : > { %770 = vmatmul.mubr.f32.gmra.mrb[4].mxu1 %v667_v48 }
 0x143   : > { %775 = vmatprep.mubr.f32.mxu1 %v1225_v0 }
 0x146   : > { %776 = vmatmul.mubr.f32.gmra.mrb[6].mxu1 %v668_v49 }
 0x147   : > { %861 = vmatprep.mubr.f32.mxu1 %v1225_v0 }
 0x20d   : > { %v759_v50 = vpop.f32.mrb[0].mxu1 }
 0x20e   : > { %v761_v51 = vpop.f32.mrb[1].mxu1  ;;  %v760_v53 = vadd.f32 %v759_v50, %v676_v52 }
 0x20f   : > { %v762_v55 = vadd.f32 %v761_v51, %v676_v52 }
 0x210   : > { %v782_v60 = vmax.f32 %v760_v53, 0.0 }
 0x211   : > { %v765_v56 = vpop.f32.mrb[2].mxu1  ;;  %v783_v62 = vmax.f32 %v762_v55, 0.0 }
 0x212   : > { %v766_v57 = vadd.f32 %v765_v56, %v681_v54  ;;  %v767_v58 = vpop.f32.mrb[3].mxu1 }
 0x213   : > { %v768_v59 = vadd.f32 %v767_v58, %v681_v54 }
 0x214   : > { %v784_v61 = vmax.f32 %v766_v57, 0.0 }
 0x215   : > { %v785_v63 = vmax.f32 %v768_v59, 0.0  ;;  %v771_v1 = vpop.f32.mrb[4].mxu1 }
 0x216   : > { %v1072_v2 = vpack.c.bf16 %v784_v61, %v782_v60  ;;  %v773_v3 = vpop.f32.mrb[5].mxu1  ;;  %v772_v0 = vadd.f32 %v771_v1, %v686_v6 }
 0x217   : > { %v1070_v7 = vpack.c.bf16 %v785_v63, %v783_v62  ;;  %v774_v9 = vadd.f32 %v773_v3, %v686_v6 }
 0x218   : > { %v786_v14 = vmax.f32 %v772_v0, 0.0 }
 0x219   : > { %v777_v10 = vpop.f32.mrb[6].mxu1  ;;  %1071 = vmatprep.subr.bf16.mxu1 %v1070_v7  ;;  %v787_v16 = vmax.f32 %v774_v9, 0.0 }
 0x21a   : > { %v778_v11 = vadd.f32 %v777_v10, %v691_v8  ;;  %v779_v12 = vpop.f32.mrb[7].mxu1  ;;  %1073 = vmatpush1.bf16.msra.mxu1 %v1072_v2 }
 0x21b   : > { %v780_v13 = vadd.f32 %v779_v12, %v691_v8 }
 0x21c   : > { %v788_v15 = vmax.f32 %v778_v11, 0.0 }
 0x21d   : > { %v789_v17 = vmax.f32 %v780_v13, 0.0 }
 0x21e   : > { %v1076_v18 = vpack.c.bf16 %v788_v15, %v786_v14 }
 0x21f   : > { %v1074_v19 = vpack.c.bf16 %v789_v17, %v787_v16 }
 0x221   : > { %1075 = vmatprep.subr.bf16.mxu1 %v1074_v19 }
 0x222   : > { %1077 = vmatpush1.bf16.msra.mxu1 %v1076_v18 }
 0x225   : > { %1028 = vmatmul.mubr.msk.f32.vlgmr.msra.gmra.mrb[8].mxu1 %vm793_vm1, %v790_v20 }
 0x2f8   : > { %v863_v22 = vpop.f32.mrb[8].mxu1 }
 0x2f9   : > { %v864_v23 = vadd.f32 %v863_v22, %v792_v21  ;;  %v865_v24 = vpop.f32.mrb[9].mxu1 }
 0x2fa   : > { %v866_v25 = vadd.f32 %v865_v24, %v792_v21 }
 0x2fb   : > { %v1029_v26 = vmul.f32 -1.442695, %v864_v23 }
 0x2fc   : > { %v1030_v27 = vmul.f32 -1.442695, %v866_v25 }
 0x2fd   : > { %1137 = vpow2.f32 %v1029_v26 }
 0x2fe   : > { %1139 = vpow2.f32 %v1030_v27 }
 0x307   : > { %v1138_v28 = vpop.eup %1137 }
 0x308   : > { %v1140_v29 = vpop.eup %1139  ;;  %v874_v30 = vadd.f32 1.0, %v1138_v28 }
 0x309   : > { %v875_v31 = vadd.f32 1.0, %v1140_v29 }
 0x30a   : > { %1141 = vrcp.f32 %v874_v30 }
 0x30b   : > { %1143 = vrcp.f32 %v875_v31 }
 0x314   : > { %v1142_v38 = vpop.eup %1141 }
 0x315   : > { %v1144_v40 = vpop.eup %1143  ;;  %v891_v41 = vrot.slane %v1142_v38, %v890_v36 }
 0x316   : > { %v895_v42 = vrot.slane %v1144_v40, %v890_v36 }
 0x317   : > { %v896_v43 = vmul.f32 %v891_v41, %v886_v37 }
 0x318   : > { %v897_v44 = vmul.f32 %v895_v42, %v887_v39 }
 0x319   : > { %v900_v45 = vrot.slane %v896_v43, 4 }
 0x31a   : > { %v901_v46 = vrot.slane %v897_v44, 4 }
 0x31b   : > { %v904_v47 = vadd.f32 %v900_v45, %v1341_v5 }
 0x31c   : > { %v905_v48 = vadd.f32 %v901_v46, %v1339_v4 }
 0x31e   : > { %v908_v49 = vcombine.low %v904_v47, %v905_v48 }
 0x320   : > { %910 = vst [vmem:[%s297_s23] sm:$0xff] %v908_v49 }
 0x321   : > { %1158 = shalt.err (!%p1155_p5)
}
 0x322   : > { %s1159_s18 = scalar_lea.hbm %s1508_s9, 128  ;;  %s1163_s21 = scalar_lea.hbm %s1562_s7, 256 }
 0x323   : > { %p1160_p6 = scmp.ne.s32.totalorder %s1508_s9, %s1159_s18  ;;  %p1164_p10 = scmp.lt.u32.totalorder %s1508_s9, %s1562_s7 }
 0x324   : > { %p1165_p11 = scmp.lt.u32.totalorder %s1163_s21, %s1159_s18  ;;  %p1167_p13 = scmp.lt.u32.totalorder %s1159_s18, %s1508_s9 }
 0x325   : > { %p1161_p7 = pnand %p1160_p6, %p1311_p4 }
 0x326   : > { %p1166_p12 = por %p1165_p11, %p1164_p10 }
 0x327   : > { %p1162_p9 = pneg %p1161_p7 }
 0x328   : > { %p1168_p0 = por %p1167_p13, %p1166_p12 }
 0x32a   : > { %p1169_p1 = pnand %p1168_p0, %p1162_p9 }
 0x32c   : > { %1172 = shalt.err (!%p1169_p1)
}
 0x32d   : > { %1078 = dma.vmem_to_hbm [thread:$0]  (%p1311_p4), %s1510_s24, 128, %s1508_s9, %s912_s11  }
 0x32e PF: > { %p1084_p2 = scmp.ge.s32.totalorder %s1223_s8, 2  ;;  %s940_s25 = sand.u32 1, %s1203_s26  }
 0x32f   : > { %s941_s6 = scalar_lea.sflag [#allocation4], %s940_s25 }
 0x330   : > { %p1081_p3 = pnand %p1084_p2, %p1318_p8 }
 0x332   : > { %1198 = dma.done.wait (!%p1081_p3), %s941_s6, 128  }
 0x333   : > { %1200 = vsyncadd (!%p1081_p3), %s941_s6, 4294967168  ;;  %s21_s8 = sadd.s32 1, %s1223_s8   ;;  %s1565_s26 = smov %s1207_s27 }
 0x334   : > { %p18_p5 = scmp.ge.s32.totalorder %s21_s8, 4   ;;  %s1566_s27 = smov %s1211_s28 }
 0x335   : > { %s1567_s28 = smov %s1324_s15  ;;  %s1568_s29 = smov %s1219_s30 }
 0x336   : > { %s1569_s30 = smov %s1571_s10  ;;  %20 = sbr.rel (!%p18_p5) target bundleno = 6 (0x6), region = 83 }
 0x33d   :  { %946 = vsyncpa [#allocation4], 1 }
 0x33e   :  { %948 = vsyncpa [#allocation4 + $0x1], 1 }

</bundles_post_ra>
